<compile_context>
chip_gen: v6e
topology: v6e:2x2x1
jax: 0.10.0
libtpu: 0.0.40
codegen_flags: <defaults>
</compile_context>

<pallas_src>
import functools

import jax
import jax.numpy as jnp
from jax import lax
from jax.experimental import pallas as pl
from jax.experimental.pallas import tpu as pltpu

BN_EPS = 1e-5
NORM_EPS = 1e-12


def _round_up(x, m):
    return (x + m - 1) // m * m


def _cdiv(a, b):
    return (a + b - 1) // b


def _vmem_budget_bytes():
    """~75% of this generation's physical VMEM (v5e/v6e: 128 MiB, v7x: 64 MiB)."""
    cap = None
    try:
        cap = getattr(pltpu.get_tpu_info(), "vmem_capacity_bytes", None)
    except Exception:
        cap = None
    if not cap:
        cap = 64 * 1024 * 1024  # conservative fallback (v7x per-TensorCore)
    return int(cap) * 3 // 4


def _pick_tile_n(n, din, h_p, dout_p, x_bytes, budget):
    """Largest batch tile whose working set fits the VMEM budget; >=2 tiles if possible."""
    resident = din * h_p * 2 + h_p * dout_p * 2 + 2 * h_p * 4  # single-buffered weights

    def usage(tn):
        pass1 = 2 * tn * (din * x_bytes + h_p * 2) + 4 * h_p * 4   # double-buffered I/O
        pass2 = 2 * tn * (h_p * 2 + dout_p * x_bytes)
        interm = tn * (h_p * 4 + max(h_p, dout_p) * 4 + din * 2)   # live f32/bf16 temps
        return resident + max(pass1, pass2) + interm

    tn = 64
    for cand in (2048, 1024, 512, 256, 128, 64):
        if usage(cand) * 5 // 4 <= budget:
            tn = cand
            break
    if n <= tn:  # keep >=2 tiles so v7x's two TensorCores both get work
        tn = max(16, _round_up(_cdiv(n, 2), 16))
    return tn


# --------------------- fused single-launch kernel (small problems) ---------------------

def _fused_kernel(x_ref, w1_ref, gamma_ref, beta_ref, w2_ref, o_ref):
    # bf16 MXU inputs, f32 accumulation.
    h = jnp.dot(x_ref[...].astype(jnp.bfloat16), w1_ref[...].astype(jnp.bfloat16),
                preferred_element_type=jnp.float32)
    # Full-batch BatchNorm (training mode) statistics, centered form (numerically robust).
    mean = jnp.mean(h, axis=0, keepdims=True)
    var = jnp.mean(jnp.square(h - mean), axis=0, keepdims=True)
    scale = gamma_ref[...] * lax.rsqrt(var + BN_EPS)
    shift = beta_ref[...] - mean * scale
    h = jnp.maximum(h * scale + shift, 0.0)
    y = jnp.dot(h.astype(jnp.bfloat16), w2_ref[...].astype(jnp.bfloat16),
                preferred_element_type=jnp.float32)
    inv = lax.rsqrt(jnp.maximum(jnp.sum(y * y, axis=1, keepdims=True),
                                NORM_EPS * NORM_EPS))
    o_ref[...] = (y * inv).astype(o_ref.dtype)


# ------------------------------ tiled two-pass kernels ---------------------------------

def _pass1_kernel(x_ref, w1_ref, h_ref, stats_ref, *, n_valid, tile_n):
    """h = x @ W1 (bf16 MXU, f32 acc); store h in bf16 + per-tile BN sum / sum-of-squares."""
    t = pl.program_id(0)
    h = jnp.dot(x_ref[...].astype(jnp.bfloat16), w1_ref[...],
                preferred_element_type=jnp.float32)
    h_ref[...] = h.astype(h_ref.dtype)
    # Mask rows of the (possibly ragged) tail tile out of the BN statistics.
    row = t * tile_n + lax.broadcasted_iota(jnp.int32, (tile_n, 1), 0)
    hm = jnp.where(row < n_valid, h, 0.0)
    s = jnp.sum(hm, axis=0, keepdims=True)
    ss = jnp.sum(hm * hm, axis=0, keepdims=True)
    stats_ref[0] = jnp.concatenate([s, ss], axis=0)


def _pass2_kernel(h_ref, scale_ref, shift_ref, w2_ref, o_ref):
    """Folded BatchNorm -> ReLU -> W2 (bf16 MXU) -> row-wise L2 normalize (EUP rsqrt)."""
    h = h_ref[...].astype(jnp.float32)
    h = jnp.maximum(h * scale_ref[...] + shift_ref[...], 0.0)
    y = jnp.dot(h.astype(jnp.bfloat16), w2_ref[...], preferred_element_type=jnp.float32)
    inv = lax.rsqrt(jnp.maximum(jnp.sum(y * y, axis=1, keepdims=True),
                                NORM_EPS * NORM_EPS))
    o_ref[...] = (y * inv).astype(o_ref.dtype)


# ------------------------------------ wrapper -------------------------------------------

@functools.partial(jax.jit, static_argnames=("tile_n", "force_tiled"))
def projection_forward(x, w1, b1, gamma, beta, w2, *, tile_n=None, force_tiled=False):
    """Linear -> BatchNorm1d(train) -> ReLU -> Linear(no bias) -> L2 normalize.

    b1 is accepted for API parity but folded out: BatchNorm subtracts the batch mean
    immediately after Linear-1, which cancels a constant bias exactly.
    """
    del b1
    n, din = x.shape
    hid = w1.shape[1]
    dout = w2.shape[1]
    x_bytes = x.dtype.itemsize

    budget = _vmem_budget_bytes()
    gamma2 = gamma.reshape(1, hid).astype(jnp.float32)
    beta2 = beta.reshape(1, hid).astype(jnp.float32)

    # ---- small-problem fast path: one launch, everything resident in VMEM --------------
    fused_est = int(1.5 * (4 * (n * din + din * hid + hid * dout + 3 * hid
                                + 2 * n * hid + 2 * n * dout)
                           + 2 * (n * din + din * hid + n * hid + hid * dout)))
    if (not force_tiled) and fused_est <= min(budget, 32 * 1024 * 1024) // 2:
        cost = pl.CostEstimate(
            flops=2 * n * (din * hid + hid * dout),
            transcendentals=n + hid,
            bytes_accessed=4 * (n * din + din * hid + hid * dout + 2 * hid + n * dout))
        return pl.pallas_call(
            _fused_kernel,
            out_shape=jax.ShapeDtypeStruct((n, dout), x.dtype),
            compiler_params=pltpu.CompilerParams(
                vmem_limit_bytes=min(budget, max(2 * fused_est, 16 * 1024 * 1024))),
            cost_estimate=cost,
        )(x, w1, gamma2, beta2, w2)

    # ---- tiled two-pass path ------------------------------------------------------------
    h_p = _round_up(hid, 128)
    dout_p = _round_up(dout, 128)

    if tile_n is None:
        tile_n = _pick_tile_n(n, din, h_p, dout_p, x_bytes, budget)
    tile_n = max(16, _round_up(min(tile_n, _round_up(n, 16)), 16))
    num_tiles = _cdiv(n, tile_n)

    f32, bf16 = jnp.float32, jnp.bfloat16
    # One-time (tiny) weight padding: lane-dense hidden/output dims, bf16 for the MXU and
    # to halve resident VMEM.  x is NOT padded/copied in XLA.
    # TODO(synk): add a hidden-dim inner grid axis in pass 2 for very large hidden dims on
    # v7x (block W2 / h so tile_n can stay large inside 64 MiB VMEM).
    w1_p = jnp.pad(w1.astype(f32), ((0, 0), (0, h_p - hid))).astype(bf16)
    w2_p = jnp.pad(w2.astype(f32), ((0, h_p - hid), (0, dout_p - dout))).astype(bf16)
    gamma_p = jnp.pad(gamma2, ((0, 0), (0, h_p - hid)), constant_values=1.0)
    beta_p = jnp.pad(beta2, ((0, 0), (0, h_p - hid)))

    def resident(shape):  # constant index_map + single-buffered
        return pl.BlockSpec(shape, lambda t: (0,) * len(shape),
                            pipeline_mode=pl.Buffered(1))

    cp = pltpu.CompilerParams(
        dimension_semantics=("parallel",),   # batch tiles independent -> both TCs on v7x
        vmem_limit_bytes=budget,
    )

    # Pass 1: h = x @ W1, store h (bf16) + per-tile BN sums.
    cost1 = pl.CostEstimate(
        flops=2 * n * din * h_p,
        transcendentals=0,
        bytes_accessed=n * din * x_bytes + din * h_p * 2 + n * h_p * 2
        + num_tiles * 2 * h_p * 4)
    h_bf16, stats = pl.pallas_call(
        functools.partial(_pass1_kernel, n_valid=n, tile_n=tile_n),
        out_shape=(jax.ShapeDtypeStruct((n, h_p), bf16),
                   jax.ShapeDtypeStruct((num_tiles, 2, h_p), f32)),
        grid=(num_tiles,),
        in_specs=[
            pl.BlockSpec((tile_n, din), lambda t: (t, 0)),   # x streams (unpadded)
            resident((din, h_p)),                            # W1 resident
        ],
        out_specs=(
            pl.BlockSpec((tile_n, h_p), lambda t: (t, 0)),   # h streams out
            pl.BlockSpec((1, 2, h_p), lambda t: (t, 0, 0)),  # per-tile stats
        ),
        compiler_params=cp,
        cost_estimate=cost1,
    )(x, w1_p)

    # Cross-tile reduce + fold BatchNorm into one scale/shift (tiny (1, h_p) XLA ops).
    ssum = jnp.sum(stats[:, 0, :], axis=0, keepdims=True)
    ssq = jnp.sum(stats[:, 1, :], axis=0, keepdims=True)
    mean = ssum / n
    # TODO(synk): E[h^2]-E[h]^2 can cancel for large-mean activations; switch to per-tile
    # centered sums + Chan's parallel formula if BN accuracy at scale becomes an issue.
    var = jnp.maximum(ssq / n - mean * mean, 0.0)
    scale = gamma_p * lax.rsqrt(var + BN_EPS)
    shift = beta_p - mean * scale

    # Pass 2: folded BN -> ReLU -> W2 -> L2 normalize (lane-dense output store).
    cost2 = pl.CostEstimate(
        flops=2 * n * h_p * dout_p,
        transcendentals=n,
        bytes_accessed=n * h_p * 2 + h_p * dout_p * 2 + 2 * h_p * 4 + n * dout_p * x_bytes)
    out_p = pl.pallas_call(
        _pass2_kernel,
        out_shape=jax.ShapeDtypeStruct((n, dout_p), x.dtype),
        grid=(num_tiles,),
        in_specs=[
            pl.BlockSpec((tile_n, h_p), lambda t: (t, 0)),   # h streams in
            resident((1, h_p)),                              # BN scale
            resident((1, h_p)),                              # BN shift
            resident((h_p, dout_p)),                         # W2 resident
        ],
        out_specs=pl.BlockSpec((tile_n, dout_p), lambda t: (t, 0)),
        compiler_params=cp,
        cost_estimate=cost2,
    )(h_bf16, scale, shift, w2_p)

    return out_p[:, :dout]


# ----------------------------------- test harness ---------------------------------------

def init_params(key, input_dim, hidden_dim, output_dim):
    k1, k2, k3 = jax.random.split(key, 3)
    bound1 = 1.0 / (input_dim ** 0.5)
    w1 = jax.random.uniform(k1, (input_dim, hidden_dim), jnp.float32, -bound1, bound1)
    b1 = jax.random.uniform(k2, (1, hidden_dim), jnp.float32, -bound1, bound1)
    gamma = jnp.ones((1, hidden_dim), jnp.float32)
    beta = jnp.zeros((1, hidden_dim), jnp.float32)
    bound2 = 1.0 / (hidden_dim ** 0.5)
    w2 = jax.random.uniform(k3, (hidden_dim, output_dim), jnp.float32, -bound2, bound2)
    return w1, b1, gamma, beta, w2


def projection_reference(x, w1, b1, gamma, beta, w2):
    """Pure-JAX reference of the PyTorch module (BatchNorm in training mode)."""
    h = jnp.dot(x, w1, precision=lax.Precision.HIGHEST) + b1
    mean = jnp.mean(h, axis=0, keepdims=True)
    var = jnp.mean((h - mean) ** 2, axis=0, keepdims=True)
    h = (h - mean) * lax.rsqrt(var + BN_EPS) * gamma + beta
    h = jnp.maximum(h, 0.0)
    y = jnp.dot(h, w2, precision=lax.Precision.HIGHEST)
    norm = jnp.sqrt(jnp.sum(y * y, axis=1, keepdims=True))
    return y / jnp.maximum(norm, NORM_EPS)


if __name__ == "__main__":
    key = jax.random.PRNGKey(0)
    kx1, kp1, kx2, kp2 = jax.random.split(key, 4)

    # Case 1: small shapes -> single-launch fused fast path.
    batch, din, hid, dout = 8, 32, 32, 16
    x = jax.random.normal(kx1, (batch, din), jnp.float32)
    params = init_params(kp1, din, hid, dout)
    out = jax.block_until_ready(projection_forward(x, *params))
    assert out.shape == (batch, dout)
    row_norms = jnp.sqrt(jnp.sum(out.astype(jnp.float32) ** 2, axis=1))
    assert bool(jnp.all(jnp.abs(row_norms - 1.0) < 1e-3))
    ref = projection_reference(x, *params)
    assert bool(jnp.allclose(out, ref, atol=2e-2, rtol=2e-2))

    # Case 2: module-default dims, ragged batch -> tiled two-pass path (bf16 MXU).
    batch2, din2, hid2, dout2 = 500, 256, 256, 128
    x2 = jax.random.normal(kx2, (batch2, din2), jnp.float32)
    params2 = init_params(kp2, din2, hid2, dout2)
    out2 = jax.block_until_ready(projection_forward(x2, *params2, force_tiled=True))
    assert out2.shape == (batch2, dout2)
    row_norms2 = jnp.sqrt(jnp.sum(out2.astype(jnp.float32) ** 2, axis=1))
    assert bool(jnp.all(jnp.abs(row_norms2 - 1.0) < 1e-3))
    ref2 = projection_reference(x2, *params2)
    assert bool(jnp.allclose(out2, ref2, atol=2e-2, rtol=2e-2))

    print("KERNEL_OK")
</pallas_src>

<mosaic_0001>
module attributes {stable_mosaic.version = 11 : i64} {
  func.func @_fused_kernel(%arg0: memref<8x32xf32, #tpu.memory_space<vmem>>, %arg1: memref<32x32xf32, #tpu.memory_space<vmem>>, %arg2: memref<1x32xf32, #tpu.memory_space<vmem>>, %arg3: memref<1x32xf32, #tpu.memory_space<vmem>>, %arg4: memref<32x16xf32, #tpu.memory_space<vmem>>, %arg5: memref<8x16xf32, #tpu.memory_space<vmem>>) attributes {dimension_semantics = [], scalar_prefetch = 0 : i64, scratch_operands = 0 : i64, tpu.core_type = #tpu.core_type<tc>} {
    %c0 = arith.constant 0 : index
    %c0_0 = arith.constant 0 : index
    %0 = vector.load %arg0[%c0, %c0_0] : memref<8x32xf32, #tpu.memory_space<vmem>>, vector<8x32xf32>
    %1 = arith.truncf %0 : vector<8x32xf32> to vector<8x32xbf16>
    %c0_1 = arith.constant 0 : index
    %c0_2 = arith.constant 0 : index
    %2 = vector.load %arg1[%c0_1, %c0_2] : memref<32x32xf32, #tpu.memory_space<vmem>>, vector<32x32xf32>
    %3 = arith.truncf %2 : vector<32x32xf32> to vector<32x32xbf16>
    %cst = arith.constant dense<0.000000e+00> : vector<8x32xf32>
    %4 = tpu.matmul %1, %3, %cst {dimension_numbers = #tpu.dot_dimension_numbers<[1], [0], [0], [1], [0, 0, 1, 1], [], []>} : vector<8x32xbf16>, vector<32x32xbf16>, vector<8x32xf32> -> vector<8x32xf32>
    %cst_3 = arith.constant dense<0.000000e+00> : vector<32xf32>
    %5 = vector.multi_reduction <add>, %4, %cst_3 [0] : vector<8x32xf32> to vector<32xf32>
    %6 = vector.shape_cast %5 : vector<32xf32> to vector<1x32xf32>
    %cst_4 = arith.constant 8.000000e+00 : f32
    %7 = vector.broadcast %cst_4 : f32 to vector<1x32xf32>
    %8 = arith.divf %6, %7 : vector<1x32xf32>
    %9 = vector.broadcast %8 : vector<1x32xf32> to vector<8x32xf32>
    %10 = arith.subf %4, %9 : vector<8x32xf32>
    %11 = arith.mulf %10, %10 : vector<8x32xf32>
    %cst_5 = arith.constant dense<0.000000e+00> : vector<32xf32>
    %12 = vector.multi_reduction <add>, %11, %cst_5 [0] : vector<8x32xf32> to vector<32xf32>
    %13 = vector.shape_cast %12 : vector<32xf32> to vector<1x32xf32>
    %cst_6 = arith.constant 8.000000e+00 : f32
    %14 = vector.broadcast %cst_6 : f32 to vector<1x32xf32>
    %15 = arith.divf %13, %14 : vector<1x32xf32>
    %c0_7 = arith.constant 0 : index
    %c0_8 = arith.constant 0 : index
    %16 = vector.load %arg2[%c0_7, %c0_8] : memref<1x32xf32, #tpu.memory_space<vmem>>, vector<1x32xf32>
    %cst_9 = arith.constant 9.99999974E-6 : f32
    %17 = vector.broadcast %cst_9 : f32 to vector<1x32xf32>
    %18 = arith.addf %15, %17 : vector<1x32xf32>
    %19 = math.rsqrt %18 : vector<1x32xf32>
    %20 = arith.mulf %16, %19 : vector<1x32xf32>
    %c0_10 = arith.constant 0 : index
    %c0_11 = arith.constant 0 : index
    %21 = vector.load %arg3[%c0_10, %c0_11] : memref<1x32xf32, #tpu.memory_space<vmem>>, vector<1x32xf32>
    %22 = arith.mulf %8, %20 : vector<1x32xf32>
    %23 = arith.subf %21, %22 : vector<1x32xf32>
    %24 = vector.broadcast %20 : vector<1x32xf32> to vector<8x32xf32>
    %25 = arith.mulf %4, %24 : vector<8x32xf32>
    %26 = vector.broadcast %23 : vector<1x32xf32> to vector<8x32xf32>
    %27 = arith.addf %25, %26 : vector<8x32xf32>
    %cst_12 = arith.constant 0.000000e+00 : f32
    %28 = vector.broadcast %cst_12 : f32 to vector<8x32xf32>
    %29 = arith.maximumf %27, %28 : vector<8x32xf32>
    %30 = arith.truncf %29 : vector<8x32xf32> to vector<8x32xbf16>
    %c0_13 = arith.constant 0 : index
    %c0_14 = arith.constant 0 : index
    %31 = vector.load %arg4[%c0_13, %c0_14] : memref<32x16xf32, #tpu.memory_space<vmem>>, vector<32x16xf32>
    %32 = arith.truncf %31 : vector<32x16xf32> to vector<32x16xbf16>
    %cst_15 = arith.constant dense<0.000000e+00> : vector<8x16xf32>
    %33 = tpu.matmul %30, %32, %cst_15 {dimension_numbers = #tpu.dot_dimension_numbers<[1], [0], [0], [1], [0, 0, 1, 1], [], []>} : vector<8x32xbf16>, vector<32x16xbf16>, vector<8x16xf32> -> vector<8x16xf32>
    %34 = arith.mulf %33, %33 : vector<8x16xf32>
    %cst_16 = arith.constant dense<0.000000e+00> : vector<8xf32>
    %35 = vector.multi_reduction <add>, %34, %cst_16 [1] : vector<8x16xf32> to vector<8xf32>
    %36 = vector.shape_cast %35 : vector<8xf32> to vector<8x1xf32>
    %cst_17 = arith.constant 1.000000e-24 : f32
    %37 = vector.broadcast %cst_17 : f32 to vector<8x1xf32>
    %38 = arith.maximumf %36, %37 : vector<8x1xf32>
    %39 = math.rsqrt %38 : vector<8x1xf32>
    %40 = vector.broadcast %39 : vector<8x1xf32> to vector<8x16xf32>
    %41 = arith.mulf %33, %40 : vector<8x16xf32>
    %c0_18 = arith.constant 0 : index
    %c0_19 = arith.constant 0 : index
    %42 = vector.load %arg5[%c0_18, %c0_19] : memref<8x16xf32, #tpu.memory_space<vmem>>, vector<8x16xf32>
    tpu.vector_store %arg5[%c0_18, %c0_19], %41 {strides = array<i32>} : memref<8x16xf32, #tpu.memory_space<vmem>>, vector<8x16xf32>,
    return
  }
}

</mosaic_0001>

<bundles_post_ra>
// kernel: projection_forward.1
= control target key start
LH: loop header
LB: loop body
LE: loop exit
PB: predicated region body
PF: predicated region fallthrough
CT: control target
= control target key end

     0   :  { %v241_v3 = vmov 0.0   ;;  %vm242_vm0 = vmmov 0   ;;  %s314_s0 = inlined_call_operand.vmem [shape: f32[8,32], index: 0, kind: input, shape index: {}]   ;;  %s315_s1 = inlined_call_operand.vmem [shape: f32[32,32], index: 1, kind: input, shape index: {}]   ;;  %s316_s2 = inlined_call_operand.vmem [shape: f32[1,32], index: 2, kind: input, shape index: {}]   ;;  %s317_s3 = inlined_call_operand.vmem [shape: f32[1,32], index: 3, kind: input, shape index: {}]   ;;  %s318_s4 = inlined_call_operand.vmem [shape: f32[32,16], index: 4, kind: input, shape index: {}]   ;;  %s319_s5 = inlined_call_operand.hbm [shape: f32[8,16], index: 5, kind: output, shape index: {}]  }
   0x1   :  { %v26_v0 = vld [vmem:[%s315_s1 + $0x10] sm:$0xff]  ;;  %v27_v1 = vld [vmem:[%s315_s1 + $0x18] sm:$0xff]  ;;  %v24_v2 = vld [vmem:[%s315_s1] sm:$0xff]  ;;  %196 = vmatprep.subr.bf16.mxu0 %v241_v3  ;;  %200 = vmatprep.mubr.msk.bf16.mxu0 %vm242_vm0, %v241_v3 }
   0x2   :  { %v29_v4 = vpack.c.bf16 %v27_v1, %v26_v0  ;;  %v25_v5 = vld [vmem:[%s315_s1 + $0x8] sm:$0xff] }
   0x3   :  { %10 = vsyncpa [#allocation3], 0  ;;  %204 = vmatprep.subr.bf16.mxu1 %v241_v3  ;;  %208 = vmatprep.mubr.msk.bf16.mxu1 %vm242_vm0, %v241_v3  ;;  %v28_v6 = vpack.c.bf16 %v25_v5, %v24_v2  ;;  %v22_v7 = vld [vmem:[%s314_s0] sm:$0xff]  ;;  %vm30_vm1 = vcmask 261120   ;;  %v118_v9 = vld [vmem:[%s318_s4 + $0x10] sm:$0xff]  ;;  %v101_v38 = vlaneseq  ;;  %vm166_vm2 = vcmask 130048  }
   0x4   :  { %197 = vmatpush3.bf16.msra.mxu0 %v29_v4  ;;  %v23_v8 = vpack.c.bf16 %v22_v7, %v22_v7  ;;  %v119_v10 = vld [vmem:[%s318_s4 + $0x18] sm:$0xff]  ;;  %v116_v12 = vld [vmem:[%s318_s4] sm:$0xff]  ;;  %v117_v13 = vld [vmem:[%s318_s4 + $0x8] sm:$0xff] }
   0x5   :  { %198 = vmatprep.subr.bf16.mxu0 %v241_v3  ;;  %v121_v11 = vpack.c.bf16 %v119_v10, %v118_v9  ;;  %v120_v14 = vpack.c.bf16 %v117_v13, %v116_v12  ;;  %v102_v39 = vshrl.u32 %v101_v38, 7  ;;  %v93_v40 = vld [vmem:[%s316_s2] sm:$0x1]  ;;  %s243_s2 = smov [#allocation2]  }
   0x6   :  { %v97_v44 = vld [vmem:[%s317_s3] sm:$0x1]  ;;  %s180_s3 = sshll.u32 %s243_s2, 4  ;;  %s181_s3 = int_to_ptr.vmem [resolvable:$true] %s180_s3 }
   0x7   :  { %205 = vmatpush3.bf16.msra.mxu1 %v121_v11  ;;  %v103_v41 = vsub.s32 0, %v102_v39  ;;  %s219_s12 = scalar_lea.vmem %s181_s3, 128  ;;  %p224_p1 = scmp.lt.s32.totalorder %s181_s3, %s181_s3 }
   0x8   :  { %199 = vmatpush3.bf16.msra.mxu0 %v28_v6  ;;  %206 = vmatprep.subr.bf16.mxu1 %v241_v3  ;;  %p220_p0 = scmp.ne.s32.totalorder %s181_s3, %s219_s12  ;;  %p225_p2 = scmp.lt.s32.totalorder %s219_s12, %s219_s12 }
   0xa   :  { %p226_p3 = por %p225_p2, %p224_p1 }
   0xb   :  { %201 = vmatmul.mubr.msk.bf16.vlgmr.msra.gmra.mxu0 %vm30_vm1, %v23_v8  ;;  %207 = vmatpush3.bf16.msra.mxu1 %v120_v14 }
   0xc   :  { %p227_p4 = pnand %p226_p3, %p220_p0 }
  0xcb   :  { %v68_v15 = vpop.f32.mrf.mxu0 }
  0xcc   :  { %v74_v16 = vsel %vm30_vm1, %v68_v15, 0.0 }
  0xcd   :  { %v75_v17 = vrot.slane %v74_v16, 4  ;;  %v202_v18 = vpop.f32.mrf.mxu0 }
  0xcf   :  { %v76_v19 = vadd.f32 %v75_v17, %v74_v16  ;;  %v71_v20 = vpop.f32.mrf.mxu0 }
  0xd1   :  { %v77_v21 = vrot.slane %v76_v19, 2  ;;  %v203_v22 = vpop.f32.mrf.mxu0 }
  0xd3   :  { %v78_v23 = vadd.f32 %v77_v21, %v76_v19 }
  0xd5   :  { %v79_v24 = vrot.slane %v78_v23, 1 }
  0xd7   :  { %v80_v25 = vadd.f32 %v79_v24, %v78_v23 }
  0xd9   :  { %v82_v26 = vmul.f32 0.125, %v80_v25 }
  0xdb   :  { %v83_v27 = vsub.f32 %v68_v15, %v82_v26 }
  0xdd   :  { %v84_v28 = vmul.f32 %v83_v27, %v83_v27 }
  0xdf   :  { %v85_v29 = vsel %vm30_vm1, %v84_v28, 0.0 }
  0xe0   :  { %v86_v30 = vrot.slane %v85_v29, 4 }
  0xe2   :  { %v87_v31 = vadd.f32 %v86_v30, %v85_v29 }
  0xe4   :  { %v88_v32 = vrot.slane %v87_v31, 2 }
  0xe6   :  { %v89_v33 = vadd.f32 %v88_v32, %v87_v31 }
  0xe8   :  { %v90_v34 = vrot.slane %v89_v33, 1 }
  0xea   :  { %v91_v35 = vadd.f32 %v90_v34, %v89_v33 }
  0xec   :  { %v92_v36 = vmul.f32 0.125, %v91_v35 }
  0xee   :  { %v94_v37 = vadd.f32 1e-05, %v92_v36 }
  0xf0   :  { %215 = vrsqrt.f32 %v94_v37 }
  0xfd   :  { %v216_v42 = vpop.eup %215 }
  0xfe   :  { %v96_v43 = vmul.f32 %v216_v42, %v93_v40 }
 0x100   :  { %v98_v45 = vmul.f32 %v96_v43, %v82_v26  ;;  %v104_v46 = vrot.slane %v96_v43, %v103_v41 }
 0x102   :  { %v99_v47 = vsub.f32 %v97_v44, %v98_v45  ;;  %v106_v48 = vmul.f32 %v104_v46, %v68_v15 }
 0x104   :  { %v111_v49 = vrot.slane %v99_v47, %v103_v41 }
 0x106   :  { %v113_v50 = vadd.f32 %v111_v49, %v106_v48 }
 0x108   :  { %v114_v51 = vmax.f32 %v113_v50, 0.0 }
 0x10a   :  { %v115_v52 = vpack.c.bf16 %v114_v51, %v114_v51 }
 0x10c   :  { %209 = vmatmul.mubr.msk.bf16.vlgmr.msra.gmra.mxu1 %vm30_vm1, %v115_v52 }
 0x1cc   :  { %v159_v53 = vpop.f32.mrf.mxu1 }
 0x1cd   :  { %v165_v54 = vmul.f32 %v159_v53, %v159_v53 }
 0x1ce   :  { %v210_v55 = vpop.f32.mrf.mxu1 }
 0x1cf   :  { %v167_v56 = vsel %vm166_vm2, %v165_v54, 0.0 }
 0x1d0   :  { %v162_v57 = vpop.f32.mrf.mxu1  ;;  %168 = vadd.xlane.f32.xlu0 %v167_v56 }
 0x1d2   :  { %v211_v58 = vpop.f32.mrf.mxu1 }
 0x259   :  { %v169_v59 = vpop.xlane.xlu0 %168 }
 0x25a   :  { %v170_v60 = vmax.f32 %v169_v59, 1e-24 }
 0x25c   :  { %217 = vrsqrt.f32 %v170_v60 }
 0x269   :  { %v218_v61 = vpop.eup %217 }
 0x26a   :  { %v172_v62 = vmul.f32 %v218_v61, %v159_v53 }
 0x26c   :  { %173 = vst.msk [vmem:[#allocation2] sm:$0xff] %vm166_vm2, %v172_v62 }
 0x26d   :  { %230 = shalt.err (!%p227_p4)
}
 0x26e   :  { %183 = dma.vmem_to_hbm [thread:$0]  %s181_s3, 128, %s319_s5, [#allocation3]  }
 0x26f   :  { %239 = dma.done.wait [#allocation3], 128  }
 0x270   :  { %240 = vsyncadd [#allocation3], 4294967168 }
 0x271   :  { %187 = vsyncpa [#allocation3], 1 }

</bundles_post_ra>
